<compile_context>
chip_gen: v7x
topology: tpu7x:2x2x1
jax: 0.10.0
libtpu: 0.0.40
codegen_flags: <defaults>
</compile_context>

<pallas_src>
import jax
import jax.numpy as jnp
from jax import lax
from jax.experimental import pallas as pl
from jax.experimental.pallas import tpu as pltpu

TILE_C = 128                      # lane width
MAX_BLOCK_BYTES = 2 * 1024 * 1024  # ~2 MiB per streamed input block


def _cdiv(a: int, b: int) -> int:
    return -(-a // b)


def _round_up(x: int, m: int) -> int:
    return ((x + m - 1) // m) * m


def _sublane_multiple(dtype) -> int:
    # Native sublane packing: 8 rows for 4-byte, 16 for 2-byte, 32 for 1-byte.
    itemsize = max(1, dtype.itemsize)
    return max(8, 32 // itemsize)


def _default_num_splits() -> int:
    # 2-way split only on chips with 2 TensorCores per chip (v7x); on
    # single-TC chips (v5e/v6e) the split is pure overhead.
    try:
        kind = jax.devices()[0].device_kind.lower()
    except Exception:
        return 1
    return 2 if ("v7" in kind or "7x" in kind) else 1


def _make_rmse_kernel(tile_r: int, rows: int, blocks_per_split: int,
                      mask_from_block):
    groups = tile_r // 8

    def _accum(o_ref, vals):
        # Fold (tile_r, 128) into the (8, 128) resident accumulator: pure
        # elementwise VPU adds over sublane groups (no XLU, no big scratch).
        o_ref[...] += jnp.sum(vals.reshape(groups, 8, TILE_C), axis=0)

    def kernel(p_ref, a_ref, o_ref):
        c = pl.program_id(0)   # split index (cross-TC parallel on v7x)
        i = pl.program_id(1)   # row-block within split (reduction axis)

        @pl.when(i == 0)
        def _init():
            o_ref[...] = jnp.zeros_like(o_ref)

        # Cast in-kernel so HBM traffic stays at the input's native width.
        d = p_ref[...].astype(jnp.float32) - a_ref[...].astype(jnp.float32)
        dd = d * d

        if mask_from_block is None:
            _accum(o_ref, dd)
        else:
            blk = c * blocks_per_split + i

            @pl.when(blk < mask_from_block)
            def _full_block():
                _accum(o_ref, dd)

            @pl.when(blk >= mask_from_block)
            def _tail_block():
                # Zero rows past the logical end: covers the partial last
                # block and fully-duplicated (clamped) blocks.  jnp.where
                # does not propagate garbage/NaN from masked-off lanes.
                row0 = blk * tile_r
                row_ids = row0 + lax.broadcasted_iota(
                    jnp.int32, (tile_r, TILE_C), 0)
                _accum(o_ref, jnp.where(row_ids < rows, dd, 0.0))

    return kernel


def rmse(pred, actual, *, num_splits=None):
    """sqrt(mean((pred - actual)**2)), computed with a Pallas TPU kernel."""
    assert pred.shape == actual.shape, "pred/actual must have the same shape"
    n = int(pred.size)

    p = pred.reshape(-1)
    a = actual.reshape(-1)

    rows = n // TILE_C
    tail = n - rows * TILE_C

    total = jnp.float32(0.0)

    # <128-element remainder handled in the wrapper (no full-array pad copy).
    if tail:
        dt = (p[rows * TILE_C:].astype(jnp.float32)
              - a[rows * TILE_C:].astype(jnp.float32))
        total = total + jnp.sum(dt * dt)

    if rows:
        if num_splits is None:
            num_splits = _default_num_splits()

        # Free reshape when n % 128 == 0; a prefix slice otherwise.
        p2 = p[:rows * TILE_C].reshape(rows, TILE_C)
        a2 = a[:rows * TILE_C].reshape(rows, TILE_C)

        sub = max(_sublane_multiple(p2.dtype), _sublane_multiple(a2.dtype))
        itemsize = max(p2.dtype.itemsize, a2.dtype.itemsize)
        max_rows = MAX_BLOCK_BYTES // (TILE_C * itemsize)   # multiple of 32
        tile_r = min(max_rows, _round_up(rows, sub))

        total_blocks = _cdiv(rows, tile_r)
        blocks_per_split = _cdiv(total_blocks, num_splits)
        last_block = total_blocks - 1

        rows_partial = (rows % tile_r) != 0
        has_clamped = blocks_per_split * num_splits != total_blocks
        if rows_partial:
            mask_from_block = last_block       # partial block + clamped dups
        elif has_clamped:
            mask_from_block = total_blocks     # only clamped duplicate blocks
        else:
            mask_from_block = None             # fully aligned: no mask at all

        def in_map(c, i):
            # Clamp so every grid step maps in-bounds; clamped duplicates are
            # fully zeroed by the in-kernel row mask.
            return (jnp.minimum(c * blocks_per_split + i, last_block), 0)

        out_rows = num_splits * 8
        in_bytes = rows * TILE_C * (p2.dtype.itemsize + a2.dtype.itemsize)
        cost = pl.CostEstimate(
            flops=4 * rows * TILE_C,
            transcendentals=0,
            bytes_accessed=in_bytes + out_rows * TILE_C * 4,
        )

        if num_splits > 1:
            # Explicit cross-TensorCore sharding of the split axis on v7x.
            dims = (pltpu.CORE_PARALLEL, pltpu.ARBITRARY)
        else:
            dims = ("parallel", "arbitrary")

        partials = pl.pallas_call(
            _make_rmse_kernel(tile_r, rows, blocks_per_split, mask_from_block),
            out_shape=jax.ShapeDtypeStruct((out_rows, TILE_C), jnp.float32),
            grid=(num_splits, blocks_per_split),
            in_specs=[
                pl.BlockSpec((tile_r, TILE_C), in_map),
                pl.BlockSpec((tile_r, TILE_C), in_map),
            ],
            out_specs=pl.BlockSpec((8, TILE_C), lambda c, i: (c, 0)),
            compiler_params=pltpu.CompilerParams(dimension_semantics=dims),
            cost_estimate=cost,
        )(p2, a2)

        total = total + jnp.sum(partials)

    return jnp.sqrt(total / jnp.float32(n))


if __name__ == "__main__":
    key = jax.random.PRNGKey(0)
    k1, k2, k3, k4 = jax.random.split(key, 4)

    # Small NCHW-shaped inputs, consistent with a typical regression target.
    pred = jax.random.normal(k1, (2, 4, 16, 16), dtype=jnp.float32)
    actual = jax.random.normal(k2, (2, 4, 16, 16), dtype=jnp.float32)

    result = jax.block_until_ready(rmse(pred, actual))
    ref = jnp.sqrt(jnp.mean((pred - actual) ** 2))
    assert jnp.allclose(result, ref, rtol=1e-5, atol=1e-6), (result, ref)

    # Lane-unaligned size: exercises the partial-block mask and the
    # wrapper-side tail sum (no pad copy).
    p_u = jax.random.normal(k3, (5, 37, 11), dtype=jnp.float32)
    a_u = jax.random.normal(k4, (5, 37, 11), dtype=jnp.float32)
    r_u = jax.block_until_ready(rmse(p_u, a_u))
    ref_u = jnp.sqrt(jnp.mean((p_u - a_u) ** 2))
    assert jnp.allclose(r_u, ref_u, rtol=1e-5, atol=1e-6), (r_u, ref_u)

    print("KERNEL_OK")
</pallas_src>

<mosaic_0001>
module attributes {stable_mosaic.version = 11 : i64} {
  func.func @kernel(%arg0: i32, %arg1: i32, %arg2: memref<16x128xf32, #tpu.memory_space<vmem>>, %arg3: memref<16x128xf32, #tpu.memory_space<vmem>>, %arg4: memref<8x128xf32, #tpu.memory_space<vmem>>) attributes {dimension_semantics = [#tpu.dimension_semantics<parallel>, #tpu.dimension_semantics<arbitrary>], iteration_bounds = array<i64: 1, 1>, scalar_prefetch = 0 : i64, scratch_operands = 0 : i64, tpu.core_type = #tpu.core_type<tc>, window_params = [{transform_indices = @transform_0, window_bounds = array<i64: 16, 128>}, {transform_indices = @transform_1, window_bounds = array<i64: 16, 128>}, {transform_indices = @transform_2, window_bounds = array<i64: 8, 128>}]} {
    %c0_i32 = arith.constant 0 : i32
    %0 = arith.cmpi eq, %arg1, %c0_i32 : i32
    %1 = arith.extui %0 : i1 to i32
    %c0_i32_0 = arith.constant 0 : i32
    %2 = arith.cmpi ne, %1, %c0_i32_0 : i32
    scf.if %2 {
      %cst_8 = arith.constant 0.000000e+00 : f32
      %12 = vector.broadcast %cst_8 : f32 to vector<8x128xf32>
      %c0_9 = arith.constant 0 : index
      %c0_10 = arith.constant 0 : index
      %13 = vector.load %arg4[%c0_9, %c0_10] : memref<8x128xf32, #tpu.memory_space<vmem>>, vector<8x128xf32>
      tpu.vector_store %arg4[%c0_9, %c0_10], %12 {strides = array<i32>} : memref<8x128xf32, #tpu.memory_space<vmem>>, vector<8x128xf32>,
    } else {
    }
    %c0 = arith.constant 0 : index
    %c0_1 = arith.constant 0 : index
    %3 = vector.load %arg2[%c0, %c0_1] : memref<16x128xf32, #tpu.memory_space<vmem>>, vector<16x128xf32>
    %c0_2 = arith.constant 0 : index
    %c0_3 = arith.constant 0 : index
    %4 = vector.load %arg3[%c0_2, %c0_3] : memref<16x128xf32, #tpu.memory_space<vmem>>, vector<16x128xf32>
    %5 = arith.subf %3, %4 : vector<16x128xf32>
    %6 = arith.mulf %5, %5 : vector<16x128xf32>
    %c0_4 = arith.constant 0 : index
    %c0_5 = arith.constant 0 : index
    %7 = vector.load %arg4[%c0_4, %c0_5] : memref<8x128xf32, #tpu.memory_space<vmem>>, vector<8x128xf32>
    %8 = vector.shape_cast %6 : vector<16x128xf32> to vector<2x8x128xf32>
    %cst = arith.constant dense<0.000000e+00> : vector<8x128xf32>
    %9 = vector.multi_reduction <add>, %8, %cst [0] : vector<2x8x128xf32> to vector<8x128xf32>
    %10 = arith.addf %7, %9 : vector<8x128xf32>
    %c0_6 = arith.constant 0 : index
    %c0_7 = arith.constant 0 : index
    %11 = vector.load %arg4[%c0_6, %c0_7] : memref<8x128xf32, #tpu.memory_space<vmem>>, vector<8x128xf32>
    tpu.vector_store %arg4[%c0_6, %c0_7], %10 {strides = array<i32>} : memref<8x128xf32, #tpu.memory_space<vmem>>, vector<8x128xf32>,
    return
  }
  func.func @transform_0(%arg0: i32, %arg1: i32) -> (i32, i32) {
    %c1_i32 = arith.constant 1 : i32
    %0 = arith.muli %arg0, %c1_i32 : i32
    %1 = arith.addi %0, %arg1 : i32
    %c0_i32 = arith.constant 0 : i32
    %2 = arith.minsi %1, %c0_i32 : i32
    %c0_i32_0 = arith.constant 0 : i32
    %c0_i32_1 = arith.constant 0 : i32
    return %2, %c0_i32_0 : i32, i32
  }
  func.func @transform_1(%arg0: i32, %arg1: i32) -> (i32, i32) {
    %c1_i32 = arith.constant 1 : i32
    %0 = arith.muli %arg0, %c1_i32 : i32
    %1 = arith.addi %0, %arg1 : i32
    %c0_i32 = arith.constant 0 : i32
    %2 = arith.minsi %1, %c0_i32 : i32
    %c0_i32_0 = arith.constant 0 : i32
    %c0_i32_1 = arith.constant 0 : i32
    return %2, %c0_i32_0 : i32, i32
  }
  func.func @transform_2(%arg0: i32, %arg1: i32) -> (i32, i32) {
    %c0_i32 = arith.constant 0 : i32
    %c0_i32_0 = arith.constant 0 : i32
    return %arg0, %c0_i32 : i32, i32
  }
}

</mosaic_0001>

<bundles_post_ra>
// kernel: tpu_custom_call.1
= control target key start
LH: loop header
LB: loop body
LE: loop exit
PB: predicated region body
PF: predicated region fallthrough
CT: control target
= control target key end

     0   :  { %7 = vsyncpa [#allocation3], 0  ;;  %s231_s0 = inlined_call_operand.hbm [shape: f32[16,128], index: 0, kind: input, shape index: {}]   ;;  %s232_s1 = inlined_call_operand.hbm [shape: f32[16,128], index: 1, kind: input, shape index: {}]   ;;  %s233_s2 = inlined_call_operand.hbm [shape: f32[8,128], index: 2, kind: output, shape index: {}]  }
   0x1   :  { %8 = vsyncpa [#allocation6], 0 }
   0x2   :  { %9 = vsyncpa [#allocation4], 0  ;;  %s175_s9 = smov [#allocation2]   ;;  %s103_s13 = scalar_lea.hbm %s231_s0, 256 }
   0x3   :  { %s21_s10 = sshll.u32 %s175_s9, 4  ;;  %p104_p0 = scmp.ne.s32.totalorder %s231_s0, %s103_s13  ;;  %s22_s10 = int_to_ptr.vmem [resolvable:$true] %s21_s10 }
   0x4   :  { %p107_p1 = scmp.lt.u32.totalorder %s103_s13, %s231_s0 }
   0x6   :  { %p109_p2 = pnand %p107_p1, %p104_p0 }
   0x8   :  { %112 = shalt.err (!%p109_p2)
}
   0x9   :  { %s113_s18 = scalar_lea.vmem %s22_s10, 256  ;;  %p118_p4 = scmp.lt.s32.totalorder %s22_s10, %s22_s10 }
   0xa   :  { %p114_p3 = scmp.ne.s32.totalorder %s22_s10, %s113_s18  ;;  %p119_p5 = scmp.lt.s32.totalorder %s113_s18, %s113_s18 }
   0xc   :  { %p120_p6 = por %p119_p5, %p118_p4 }
   0xe   :  { %p121_p7 = pnand %p120_p6, %p114_p3 }
  0x10   :  { %124 = shalt.err (!%p121_p7)
}
  0x11   :  { %s176_s19 = smov 128   ;;  %s177_s20 = smov 8  }
  0x12   :  { %27 = dma.hbm_to_vmem [thread:$0]  %s231_s0, 256, %s22_s10, [#allocation3], %s176_s19, %s176_s19, %s177_s20  }
  0x13   :  { %s178_s23 = smov [#allocation5]   ;;  %s125_s27 = scalar_lea.hbm %s232_s1, 256 }
  0x14   :  { %s39_s24 = sshll.u32 %s178_s23, 4  ;;  %p126_p8 = scmp.ne.s32.totalorder %s232_s1, %s125_s27  ;;  %s40_s24 = int_to_ptr.vmem [resolvable:$true] %s39_s24 }
  0x15   :  { %p129_p9 = scmp.lt.u32.totalorder %s125_s27, %s232_s1 }
  0x17   :  { %p131_p10 = pnand %p129_p9, %p126_p8 }
  0x19   :  { %134 = shalt.err (!%p131_p10)
}
  0x1a   :  { %s135_s4 = scalar_lea.vmem %s40_s24, 256  ;;  %p140_p12 = scmp.lt.s32.totalorder %s40_s24, %s40_s24 }
  0x1b   :  { %p136_p11 = scmp.ne.s32.totalorder %s40_s24, %s135_s4  ;;  %p141_p13 = scmp.lt.s32.totalorder %s135_s4, %s135_s4 }
  0x1d   :  { %p142_p0 = por %p141_p13, %p140_p12 }
  0x1f   :  { %p143_p1 = pnand %p142_p0, %p136_p11 }
  0x21   :  { %146 = shalt.err (!%p143_p1)
}
  0x22   :  { %45 = dma.hbm_to_vmem [thread:$0]  %s232_s1, 256, %s40_s24, [#allocation6], %s176_s19, %s176_s19, %s177_s20  }
  0x23   :  { %169 = dma.done.wait [#allocation3], 256  }
  0x24   :  { %170 = vsyncadd [#allocation3], 4294967040 }
  0x25   :  { %171 = dma.done.wait [#allocation6], 256  }
  0x26   :  { %172 = vsyncadd [#allocation6], 4294967040  ;;  %v65_v0 = vld [vmem:[#allocation2] sm:$0xff]  ;;  %v66_v1 = vld [vmem:[#allocation2 + $0x8] sm:$0xff]  ;;  %s179_s6 = smov [#allocation7]  }
  0x27   :  { %v67_v2 = vld [vmem:[#allocation5] sm:$0xff]  ;;  %v68_v3 = vld [vmem:[#allocation5 + $0x8] sm:$0xff]  ;;  %s83_s7 = sshll.u32 %s179_s6, 4  ;;  %s84_s7 = int_to_ptr.vmem [resolvable:$true] %s83_s7 }
  0x28   :  { %v69_v4 = vsub.f32 %v65_v0, %v67_v2  ;;  %v70_v5 = vsub.f32 %v66_v1, %v68_v3  ;;  %s147_s8 = scalar_lea.vmem %s84_s7, 128  ;;  %p152_p3 = scmp.lt.s32.totalorder %s84_s7, %s84_s7 }
  0x29   :  { %p148_p2 = scmp.ne.s32.totalorder %s84_s7, %s147_s8  ;;  %p153_p4 = scmp.lt.s32.totalorder %s147_s8, %s147_s8 }
  0x2a   :  { %v71_v6 = vmul.f32 %v69_v4, %v69_v4  ;;  %v72_v7 = vmul.f32 %v70_v5, %v70_v5 }
  0x2b   :  { %p154_p5 = por %p153_p4, %p152_p3 }
  0x2c   :  { %v74_v8 = vadd.f32 %v72_v7, %v71_v6 }
  0x2d   :  { %p155_p6 = pnand %p154_p5, %p148_p2 }
  0x2e   :  { %76 = vst [vmem:[#allocation7] sm:$0xff] %v74_v8 }
  0x2f   :  { %158 = shalt.err (!%p155_p6)
}
  0x30   :  { %s159_s10 = scalar_lea.hbm %s233_s2, 128 }
  0x31   :  { %p160_p7 = scmp.ne.s32.totalorder %s233_s2, %s159_s10  ;;  %p163_p8 = scmp.lt.u32.totalorder %s159_s10, %s233_s2 }
  0x33   :  { %p165_p9 = pnand %p163_p8, %p160_p7 }
  0x35   :  { %168 = shalt.err (!%p165_p9)
}
  0x36   :  { %86 = dma.vmem_to_hbm [thread:$0]  %s84_s7, 128, %s233_s2, [#allocation4]  }
  0x37   :  { %173 = dma.done.wait [#allocation4], 128  }
  0x38   :  { %174 = vsyncadd [#allocation4], 4294967168 }
  0x39   :  { %90 = vsyncpa [#allocation3], 1 }
  0x3a   :  { %91 = vsyncpa [#allocation6], 1 }
  0x3b   :  { %92 = vsyncpa [#allocation4], 1 }

</bundles_post_ra>
